<compile_context>
chip_gen: v7x
topology: tpu7x:2x2x1
jax: 0.10.0
libtpu: 0.0.40
codegen_flags: <defaults>
</compile_context>

<pallas_src>
import math
import jax
import jax.numpy as jnp
from jax.experimental import pallas as pl
from jax.experimental.pallas import tpu as pltpu

_NEG = -1e30  # finite "minus infinity" for per-graph max tracking


def _round_up(x, m):
    return ((x + m - 1) // m) * m


# --------------------------------------------------------------------------
# Kernel 1: attention pooling (GlobalAttention, gate_nn=Linear(H,1)),
# one call per modality, online per-graph softmax over node tiles.
# --------------------------------------------------------------------------

def _attn_pool_kernel(x_ref, ids_ref, gw_ref, out_ref, m_sc, l_sc, acc_sc):
    """One (batch-block, node-tile) grid step.

    x_ref:   (tile_n, H_pad)  node features, natural layout (nodes on sublanes)
    ids_ref: (1, tile_n)      int32 graph id per node (-1 for padding nodes)
    gw_ref:  (1, H_pad)       gate weight row (bias is softmax-invariant)
    out_ref: (b_blk, H_pad)   pooled per-graph embedding (written at last tile)
    scratch: m (b_blk,1) running max, l (b_blk,1) running denom,
             acc (b_blk,H_pad) running weighted sum.
    """
    t = pl.program_id(1)
    n_t = pl.num_programs(1)
    b_blk = out_ref.shape[0]
    row0 = pl.program_id(0) * b_blk

    @pl.when(t == 0)
    def _():
        m_sc[...] = jnp.full_like(m_sc, _NEG)
        l_sc[...] = jnp.zeros_like(l_sc)
        acc_sc[...] = jnp.zeros_like(acc_sc)

    xf = x_ref[...].astype(jnp.float32)          # [tile_n, H_pad]
    ids = ids_ref[...]                            # [1, tile_n] int32
    tile_n = xf.shape[0]

    # per-node gate on the lane axis: thin A.B^T contraction over H (bias
    # omitted -- constant per-node shift cancels in the per-graph softmax)
    gate = jax.lax.dot_general(
        gw_ref[...].astype(jnp.float32), xf,
        (((1,), (1,)), ((), ())),
        preferred_element_type=jnp.float32)       # [1, tile_n]

    # graph-membership mask built in-kernel (batch rows on sublanes)
    rows = jax.lax.broadcasted_iota(jnp.int32, (b_blk, tile_n), 0) + row0
    mask = rows == ids                            # [b_blk, tile_n] bool
    mask_f = mask.astype(jnp.float32)

    # --- online per-graph softmax update ---
    m_old = m_sc[...]                                                  # [b_blk,1]
    gate_m = jnp.where(mask, gate, _NEG)
    m_new = jnp.maximum(m_old, jnp.max(gate_m, axis=1, keepdims=True))
    alpha = jnp.exp(m_old - m_new)                                     # [b_blk,1]

    # per-node shift (one sublane reduce) -> exp volume is O(tile_n), not
    # O(b_blk*tile_n); min(.,0) guards nodes outside this batch block.
    m_node = jnp.sum(mask_f * m_new, axis=0, keepdims=True)            # [1,tile_n]
    e = jnp.exp(jnp.minimum(gate - m_node, 0.0))                       # [1,tile_n]
    p = mask_f * e                                                     # [b_blk,tile_n]

    l_sc[...] = alpha * l_sc[...] + jnp.sum(p, axis=1, keepdims=True)
    # natural (B,K)x(K,H) accumulate on the MXU; K = tile_n (multiple of 256)
    acc_sc[...] = alpha * acc_sc[...] + jnp.dot(
        p, xf, preferred_element_type=jnp.float32)
    m_sc[...] = m_new

    @pl.when(t == n_t - 1)
    def _():
        inv = pl.reciprocal(jnp.maximum(l_sc[...], 1e-30), approx=True)  # EUP
        out_ref[...] = acc_sc[...] * inv


def attention_pool(x, ids, gate_w_row, b_pad, *, tile_n=512, num_b_blocks=1):
    """x: [N_pad, H_pad] (natural layout), ids: [1, N_pad] int32 -> [b_pad, H_pad]."""
    n_pad, h_pad = x.shape
    assert n_pad % tile_n == 0 and h_pad % 128 == 0
    assert b_pad % num_b_blocks == 0 and (b_pad // num_b_blocks) % 8 == 0
    b_blk = b_pad // num_b_blocks
    n_tiles = n_pad // tile_n
    return pl.pallas_call(
        _attn_pool_kernel,
        out_shape=jax.ShapeDtypeStruct((b_pad, h_pad), jnp.float32),
        grid_spec=pltpu.PrefetchScalarGridSpec(
            num_scalar_prefetch=0,
            grid=(num_b_blocks, n_tiles),
            in_specs=[
                pl.BlockSpec((tile_n, h_pad), lambda b, t: (t, 0)),
                pl.BlockSpec((1, tile_n), lambda b, t: (0, t)),
                pl.BlockSpec((1, h_pad), lambda b, t: (0, 0)),
            ],
            out_specs=pl.BlockSpec((b_blk, h_pad), lambda b, t: (b, 0)),
            scratch_shapes=[
                pltpu.VMEM((b_blk, 1), jnp.float32),      # running max
                pltpu.VMEM((b_blk, 1), jnp.float32),      # running denom
                pltpu.VMEM((b_blk, h_pad), jnp.float32),  # running numerator
            ],
        ),
        compiler_params=pltpu.CompilerParams(
            dimension_semantics=("parallel", "arbitrary")),
    )(x, ids, gate_w_row)


# --------------------------------------------------------------------------
# Kernel 2: fused post-pool head
#   (pro_gnn/pro_seq/pro_geo MLPs + L2-norm + WeightFusion + output MLP)
# Output: (V+1, B_pad, SEG) lane-dense segments [cl_0 | cl_1 | cl_2 | pred].
# --------------------------------------------------------------------------

def _fused_head_kernel(pooled_ref, pw1_ref, pb1_ref, pw2_ref, pb2_ref,
                       fw_ref, fb_ref, ow1_ref, ob1_ref, ow2_ref, ob2_ref,
                       out_ref):
    V, B, Hp = pooled_ref.shape

    acc = jnp.zeros((B, Hp), jnp.float32)
    for i in range(V):                                   # static unroll, V == 3
        g = pooled_ref[i]                                # [B, H_pad]
        # projection head i: Linear(H,L) -> ReLU -> Linear(L,SEG)  (dropout=id)
        h = jnp.maximum(
            jnp.dot(g, pw1_ref[i], preferred_element_type=jnp.float32)
            + pb1_ref[i], 0.0)
        # pw2/pb2 are zero-padded to SEG output lanes -> full-width store
        out_ref[i] = jnp.dot(h, pw2_ref[i],
                             preferred_element_type=jnp.float32) + pb2_ref[i]
        # F.normalize(g, p=2, dim=1), eps=1e-12 via rsqrt on the EUP
        ss = jnp.sum(g * g, axis=1, keepdims=True)
        gn = g * jax.lax.rsqrt(jnp.maximum(ss, 1e-24))
        # WeightFusion: sum_i normalize(x_i) * weight_i (+ bias below)
        acc = acc + gn * fw_ref[0, i]

    emb = acc + fb_ref[...]
    # output_layer: Linear(H,H) -> ReLU -> Dropout(id) -> Linear(H,SEG-padded)
    hh = jnp.maximum(
        jnp.dot(emb, ow1_ref[...], preferred_element_type=jnp.float32)
        + ob1_ref[...], 0.0)
    out_ref[V] = jnp.dot(hh, ow2_ref[...],
                         preferred_element_type=jnp.float32) + ob2_ref[...]


_VMEM = pl.BlockSpec(memory_space=pltpu.MemorySpace.VMEM)
_SMEM = pl.BlockSpec(memory_space=pltpu.MemorySpace.SMEM)


def fused_head(pooled, pw1, pb1, pw2, pb2, fusion_w, fusion_b,
               ow1, ob1, ow2, ob2, seg):
    V, b_pad, _ = pooled.shape
    return pl.pallas_call(
        _fused_head_kernel,
        out_shape=jax.ShapeDtypeStruct((V + 1, b_pad, seg), jnp.float32),
        in_specs=[_VMEM, _VMEM, _VMEM, _VMEM, _VMEM,     # pooled + pro weights
                  _SMEM, _VMEM,                          # fusion scalars / bias
                  _VMEM, _VMEM, _VMEM, _VMEM],           # output MLP
        out_specs=_VMEM,
    )(pooled, pw1, pb1, pw2, pb2, fusion_w, fusion_b, ow1, ob1, ow2, ob2)


# --------------------------------------------------------------------------
# Parameter construction (deterministic, PyTorch-default-style bounds)
# --------------------------------------------------------------------------

def _linear(key, fan_in, fan_out):
    kw, kb = jax.random.split(key)
    bound = 1.0 / math.sqrt(fan_in)
    w = jax.random.uniform(kw, (fan_in, fan_out), jnp.float32, -bound, bound)
    b = jax.random.uniform(kb, (1, fan_out), jnp.float32, -bound, bound)
    return w, b


def init_params(key, hidden, latent, out_dim, n_views):
    ks = jax.random.split(key, 12)
    p = {}
    # shared Global_Attention pool: gate_nn = Linear(hidden, 1)
    gw, gb = _linear(ks[0], hidden, 1)
    p["pool_gate_w"], p["pool_gate_b"] = gw, gb                 # [H,1], [1,1]
    # pro_gnn / pro_seq / pro_geo (pro_num == 3), stacked along modality axis
    w1s, b1s, w2s, b2s = [], [], [], []
    for i in range(n_views):
        w1, b1 = _linear(ks[1 + 2 * i], hidden, latent)
        w2, b2 = _linear(ks[2 + 2 * i], latent, latent)
        w1s.append(w1); b1s.append(b1); w2s.append(w2); b2s.append(b2)
    p["pro_w1"] = jnp.stack(w1s)                                # [V, H, L]
    p["pro_b1"] = jnp.stack(b1s)                                # [V, 1, L]
    p["pro_w2"] = jnp.stack(w2s)                                # [V, L, L]
    p["pro_b2"] = jnp.stack(b2s)                                # [V, 1, L]
    # WeightFusion(feat_views, feat_dim=hidden)
    bound = 1.0 / math.sqrt(n_views)
    p["fusion_w"] = jax.random.uniform(ks[7], (1, n_views), jnp.float32, -bound, bound)
    p["fusion_b"] = jax.random.uniform(ks[8], (1, hidden), jnp.float32, -bound, bound)
    # output_layer: Linear(H,H)+ReLU+Dropout+Linear(H,out_dim)
    w1, b1 = _linear(ks[9], hidden, hidden)
    w2, b2 = _linear(ks[10], hidden, out_dim)
    p["out_w1"], p["out_b1"], p["out_w2"], p["out_b2"] = w1, b1, w2, b2
    return p


# --------------------------------------------------------------------------
# Multi_modal forward (graph + sequence + geometry, fusion == 3, norm == True)
# --------------------------------------------------------------------------

def multi_modal_forward(params, node_x_list, batch_list, num_graphs, *,
                        tile_n=512, num_b_blocks=1):
    # TODO(synk): MPNEncoder / TrfmSeq2seq / GeoGNN / UniMol backbones are
    # external modules; their node-level outputs are taken as inputs here.
    V = len(node_x_list)
    H = node_x_list[0].shape[1]
    H_pad = _round_up(H, 128)                 # no-op for production hidden dims
    b_pad = _round_up(max(num_graphs, 8 * num_b_blocks), 8 * num_b_blocks)

    gw_row = jnp.pad(params["pool_gate_w"], ((0, H_pad - H), (0, 0))).T  # [1,H_pad]

    # one pool call per modality: natural [N, H] layout, per-modality node count
    pooled = []
    for x, bid in zip(node_x_list, batch_list):
        n = x.shape[0]
        n_pad = _round_up(n, tile_n)
        xp = jnp.pad(x, ((0, n_pad - n), (0, H_pad - H)))        # pad-only pass
        ids = jnp.pad(bid.astype(jnp.int32), (0, n_pad - n),
                      constant_values=-1)[None, :]               # [1, N_pad]
        pooled.append(attention_pool(xp, ids, gw_row, b_pad,
                                     tile_n=tile_n, num_b_blocks=num_b_blocks))
    pooled = jnp.stack(pooled, axis=0)                           # [V, B_pad, H_pad]

    # --- fused head: pad weights so every final matmul emits a full SEG-wide
    #     lane-dense segment (zero columns in the padded region) ---
    L = params["pro_w2"].shape[2]
    OUT = params["out_w2"].shape[1]
    SEG = _round_up(max(L, OUT), 128)
    ph = H_pad - H
    pw1 = jnp.pad(params["pro_w1"], ((0, 0), (0, ph), (0, 0)))
    pb1 = params["pro_b1"]
    pw2 = jnp.pad(params["pro_w2"], ((0, 0), (0, 0), (0, SEG - L)))
    pb2 = jnp.pad(params["pro_b2"], ((0, 0), (0, 0), (0, SEG - L)))
    fb = jnp.pad(params["fusion_b"], ((0, 0), (0, ph)))
    ow1 = jnp.pad(params["out_w1"], ((0, ph), (0, ph)))
    ob1 = jnp.pad(params["out_b1"], ((0, 0), (0, ph)))
    ow2 = jnp.pad(params["out_w2"], ((0, ph), (0, SEG - OUT)))
    ob2 = jnp.pad(params["out_b2"], ((0, 0), (0, SEG - OUT)))

    slab = fused_head(pooled, pw1, pb1, pw2, pb2, params["fusion_w"], fb,
                      ow1, ob1, ow2, ob2, SEG)                   # [V+1, B_pad, SEG]

    cl_list = [slab[i, :num_graphs, :L] for i in range(V)]
    pred = slab[V, :num_graphs, :OUT]
    # args.norm=True -> no dropout on molecule_emb; args.FDS=False -> molecule_emb1=None
    return cl_list, pred, None


# --------------------------------------------------------------------------
# Pure-JAX reference (for correctness cross-check)
# --------------------------------------------------------------------------

def _ref_forward(params, node_x, batch_ids, num_graphs):
    def pool(x, bid):
        gate = x @ params["pool_gate_w"] + params["pool_gate_b"][0, 0]        # [N,1]
        oh = (bid[None, :] == jnp.arange(num_graphs)[:, None]).astype(jnp.float32)
        e = jnp.exp(gate - jnp.max(gate))
        return (oh @ (e * x)) / (oh @ e)

    def mlp(x, w1, b1, w2, b2):
        return jnp.maximum(x @ w1 + b1, 0.0) @ w2 + b2

    g = [pool(x, b) for x, b in zip(node_x, batch_ids)]
    cl = [mlp(g[i], params["pro_w1"][i], params["pro_b1"][i],
              params["pro_w2"][i], params["pro_b2"][i]) for i in range(len(g))]
    xs = jnp.stack(g, 0)
    xs = xs / jnp.maximum(jnp.linalg.norm(xs, axis=-1, keepdims=True), 1e-12)
    emb = jnp.einsum("vbh,v->bh", xs, params["fusion_w"][0]) + params["fusion_b"]
    pred = mlp(emb, params["out_w1"], params["out_b1"],
               params["out_w2"], params["out_b2"])
    return cl, pred


def _make_ids(key, n, b):
    extra = jax.random.randint(key, (n - b,), 0, b)
    return jnp.sort(jnp.concatenate([jnp.arange(b), extra])).astype(jnp.int32)


# --------------------------------------------------------------------------

if __name__ == "__main__":
    B, H, LATENT, OUT, V = 4, 32, 32, 8, 3
    N_GNN, N_SEQ, N_GEO = 300, 70, 40       # per-modality node / token counts
    TILE_N = 256                            # multiple of 256 (fills v6e/v7x MXU);
                                            # use 512-1024 at production sizes

    key = jax.random.PRNGKey(0)
    k_par, k1, k2, k3, k4, k5, k6 = jax.random.split(key, 7)
    params = init_params(k_par, H, LATENT, OUT, V)

    # synthetic node-level encoder outputs (one array per modality)
    node_gnn_x = jax.random.normal(k1, (N_GNN, H), jnp.float32)
    node_seq_x = jax.random.normal(k2, (N_SEQ, H), jnp.float32)
    node_geo_x = jax.random.normal(k3, (N_GEO, H), jnp.float32)
    ids_gnn = _make_ids(k4, N_GNN, B)
    ids_seq = _make_ids(k5, N_SEQ, B)
    ids_geo = _make_ids(k6, N_GEO, B)

    cl_list, pred, emb1 = multi_modal_forward(
        params, [node_gnn_x, node_seq_x, node_geo_x],
        [ids_gnn, ids_seq, ids_geo], B, tile_n=TILE_N, num_b_blocks=1)
    jax.block_until_ready(pred)
    for c in cl_list:
        jax.block_until_ready(c)

    # cross-check against plain-JAX reference
    cl_ref, pred_ref = _ref_forward(
        params, [node_gnn_x, node_seq_x, node_geo_x],
        [ids_gnn, ids_seq, ids_geo], B)
    assert pred.shape == (B, OUT)
    assert all(c.shape == (B, LATENT) for c in cl_list)
    assert jnp.allclose(pred, pred_ref, rtol=5e-3, atol=5e-3)
    for c, cr in zip(cl_list, cl_ref):
        assert jnp.allclose(c, cr, rtol=5e-3, atol=5e-3)
    assert emb1 is None  # args.FDS == False

    print("KERNEL_OK")
</pallas_src>

<mosaic_0001>
module attributes {stable_mosaic.version = 11 : i64} {
  func.func @_attn_pool_kernel(%arg0: i32, %arg1: i32, %arg2: memref<256x128xf32, #tpu.memory_space<vmem>>, %arg3: memref<1x256xi32, #tpu.memory_space<vmem>>, %arg4: memref<1x128xf32, #tpu.memory_space<vmem>>, %arg5: memref<8x128xf32, #tpu.memory_space<vmem>>, %arg6: memref<8x1xf32, #tpu.memory_space<vmem>>, %arg7: memref<8x1xf32, #tpu.memory_space<vmem>>, %arg8: memref<8x128xf32, #tpu.memory_space<vmem>>) attributes {dimension_semantics = [#tpu.dimension_semantics<parallel>, #tpu.dimension_semantics<arbitrary>], iteration_bounds = array<i64: 1, 2>, scalar_prefetch = 0 : i64, scratch_operands = 3 : i64, tpu.core_type = #tpu.core_type<tc>, window_params = [{transform_indices = @transform_0, window_bounds = array<i64: 256, 128>}, {transform_indices = @transform_1, window_bounds = array<i64: 1, 256>}, {pipeline_mode = #tpu.pipeline_mode<synchronous>, transform_indices = @transform_2, window_bounds = array<i64: 1, 128>}, {transform_indices = @transform_3, window_bounds = array<i64: 8, 128>}]} {
    %c8_i32 = arith.constant 8 : i32
    %0 = arith.muli %arg0, %c8_i32 : i32
    %c0_i32 = arith.constant 0 : i32
    %1 = arith.cmpi eq, %arg1, %c0_i32 : i32
    %2 = arith.extui %1 : i1 to i32
    %c0_i32_0 = arith.constant 0 : i32
    %3 = arith.cmpi ne, %2, %c0_i32_0 : i32
    scf.if %3 {
      %cst_25 = arith.constant -1.000000e+30 : f32
      %51 = vector.broadcast %cst_25 : f32 to vector<8x1xf32>
      %c0_26 = arith.constant 0 : index
      %c0_27 = arith.constant 0 : index
      %52 = vector.load %arg6[%c0_26, %c0_27] : memref<8x1xf32, #tpu.memory_space<vmem>>, vector<8x1xf32>
      tpu.vector_store %arg6[%c0_26, %c0_27], %51 {strides = array<i32>} : memref<8x1xf32, #tpu.memory_space<vmem>>, vector<8x1xf32>,
      %cst_28 = arith.constant 0.000000e+00 : f32
      %53 = vector.broadcast %cst_28 : f32 to vector<8x1xf32>
      %c0_29 = arith.constant 0 : index
      %c0_30 = arith.constant 0 : index
      %54 = vector.load %arg7[%c0_29, %c0_30] : memref<8x1xf32, #tpu.memory_space<vmem>>, vector<8x1xf32>
      tpu.vector_store %arg7[%c0_29, %c0_30], %53 {strides = array<i32>} : memref<8x1xf32, #tpu.memory_space<vmem>>, vector<8x1xf32>,
      %cst_31 = arith.constant 0.000000e+00 : f32
      %55 = vector.broadcast %cst_31 : f32 to vector<8x128xf32>
      %c0_32 = arith.constant 0 : index
      %c0_33 = arith.constant 0 : index
      %56 = vector.load %arg8[%c0_32, %c0_33] : memref<8x128xf32, #tpu.memory_space<vmem>>, vector<8x128xf32>
      tpu.vector_store %arg8[%c0_32, %c0_33], %55 {strides = array<i32>} : memref<8x128xf32, #tpu.memory_space<vmem>>, vector<8x128xf32>,
    } else {
    }
    %c0 = arith.constant 0 : index
    %c0_1 = arith.constant 0 : index
    %4 = vector.load %arg2[%c0, %c0_1] : memref<256x128xf32, #tpu.memory_space<vmem>>, vector<256x128xf32>
    %c0_2 = arith.constant 0 : index
    %c0_3 = arith.constant 0 : index
    %5 = vector.load %arg3[%c0_2, %c0_3] : memref<1x256xi32, #tpu.memory_space<vmem>>, vector<1x256xi32>
    %c0_4 = arith.constant 0 : index
    %c0_5 = arith.constant 0 : index
    %6 = vector.load %arg4[%c0_4, %c0_5] : memref<1x128xf32, #tpu.memory_space<vmem>>, vector<1x128xf32>
    %cst = arith.constant dense<0.000000e+00> : vector<1x256xf32>
    %7 = tpu.matmul %6, %4, %cst {dimension_numbers = #tpu.dot_dimension_numbers<[1], [1], [0], [0], [0, 0, 1, 0], [], []>} : vector<1x128xf32>, vector<256x128xf32>, vector<1x256xf32> -> vector<1x256xf32>
    %8 = tpu.iota {dimensions = array<i32: 0>} : vector<8x256xi32>
    %9 = vector.broadcast %0 : i32 to vector<8x256xi32>
    %10 = arith.addi %8, %9 : vector<8x256xi32>
    %11 = vector.broadcast %5 : vector<1x256xi32> to vector<8x256xi32>
    %12 = arith.cmpi eq, %10, %11 : vector<8x256xi32>
    %13 = arith.extui %12 : vector<8x256xi1> to vector<8x256xi32>
    %14 = arith.sitofp %13 : vector<8x256xi32> to vector<8x256xf32>
    %c0_6 = arith.constant 0 : index
    %c0_7 = arith.constant 0 : index
    %15 = vector.load %arg6[%c0_6, %c0_7] : memref<8x1xf32, #tpu.memory_space<vmem>>, vector<8x1xf32>
    %cst_8 = arith.constant -1.000000e+30 : f32
    %16 = vector.shape_cast %7 : vector<1x256xf32> to vector<1x256xf32>
    %17 = vector.broadcast %16 : vector<1x256xf32> to vector<8x256xf32>
    %18 = vector.broadcast %cst_8 : f32 to vector<8x256xf32>
    %19 = arith.select %12, %17, %18 : vector<8x256xi1>, vector<8x256xf32>
    %cst_9 = arith.constant dense<0xFF800000> : vector<8xf32>
    %20 = vector.multi_reduction <maximumf>, %19, %cst_9 [1] : vector<8x256xf32> to vector<8xf32>
    %21 = vector.shape_cast %20 : vector<8xf32> to vector<8x1xf32>
    %22 = arith.maximumf %15, %21 : vector<8x1xf32>
    %23 = arith.subf %15, %22 : vector<8x1xf32>
    %24 = math.exp %23 : vector<8x1xf32>
    %25 = vector.broadcast %22 : vector<8x1xf32> to vector<8x256xf32>
    %26 = arith.mulf %14, %25 : vector<8x256xf32>
    %cst_10 = arith.constant dense<0.000000e+00> : vector<256xf32>
    %27 = vector.multi_reduction <add>, %26, %cst_10 [0] : vector<8x256xf32> to vector<256xf32>
    %28 = vector.shape_cast %27 : vector<256xf32> to vector<1x256xf32>
    %29 = arith.subf %7, %28 : vector<1x256xf32>
    %cst_11 = arith.constant 0.000000e+00 : f32
    %30 = vector.broadcast %cst_11 : f32 to vector<1x256xf32>
    %31 = arith.minimumf %29, %30 : vector<1x256xf32>
    %32 = math.exp %31 : vector<1x256xf32>
    %33 = vector.broadcast %32 : vector<1x256xf32> to vector<8x256xf32>
    %34 = arith.mulf %14, %33 : vector<8x256xf32>
    %c0_12 = arith.constant 0 : index
    %c0_13 = arith.constant 0 : index
    %35 = vector.load %arg7[%c0_12, %c0_13] : memref<8x1xf32, #tpu.memory_space<vmem>>, vector<8x1xf32>
    %36 = arith.mulf %24, %35 : vector<8x1xf32>
    %cst_14 = arith.constant dense<0.000000e+00> : vector<8xf32>
    %37 = vector.multi_reduction <add>, %34, %cst_14 [1] : vector<8x256xf32> to vector<8xf32>
    %38 = vector.shape_cast %37 : vector<8xf32> to vector<8x1xf32>
    %39 = arith.addf %36, %38 : vector<8x1xf32>
    %c0_15 = arith.constant 0 : index
    %c0_16 = arith.constant 0 : index
    %40 = vector.load %arg7[%c0_15, %c0_16] : memref<8x1xf32, #tpu.memory_space<vmem>>, vector<8x1xf32>
    tpu.vector_store %arg7[%c0_15, %c0_16], %39 {strides = array<i32>} : memref<8x1xf32, #tpu.memory_space<vmem>>, vector<8x1xf32>,
    %c0_17 = arith.constant 0 : index
    %c0_18 = arith.constant 0 : index
    %41 = vector.load %arg8[%c0_17, %c0_18] : memref<8x128xf32, #tpu.memory_space<vmem>>, vector<8x128xf32>
    %42 = vector.broadcast %24 : vector<8x1xf32> to vector<8x128xf32>
    %43 = arith.mulf %42, %41 : vector<8x128xf32>
    %cst_19 = arith.constant dense<0.000000e+00> : vector<8x128xf32>
    %44 = tpu.matmul %34, %4, %cst_19 {dimension_numbers = #tpu.dot_dimension_numbers<[1], [0], [0], [1], [0, 0, 1, 1], [], []>} : vector<8x256xf32>, vector<256x128xf32>, vector<8x128xf32> -> vector<8x128xf32>
    %45 = arith.addf %43, %44 : vector<8x128xf32>
    %c0_20 = arith.constant 0 : index
    %c0_21 = arith.constant 0 : index
    %46 = vector.load %arg8[%c0_20, %c0_21] : memref<8x128xf32, #tpu.memory_space<vmem>>, vector<8x128xf32>
    tpu.vector_store %arg8[%c0_20, %c0_21], %45 {strides = array<i32>} : memref<8x128xf32, #tpu.memory_space<vmem>>, vector<8x128xf32>,
    %c0_22 = arith.constant 0 : index
    %c0_23 = arith.constant 0 : index
    %47 = vector.load %arg6[%c0_22, %c0_23] : memref<8x1xf32, #tpu.memory_space<vmem>>, vector<8x1xf32>
    tpu.vector_store %arg6[%c0_22, %c0_23], %22 {strides = array<i32>} : memref<8x1xf32, #tpu.memory_space<vmem>>, vector<8x1xf32>,
    %c1_i32 = arith.constant 1 : i32
    %48 = arith.cmpi eq, %arg1, %c1_i32 : i32
    %49 = arith.extui %48 : i1 to i32
    %c0_i32_24 = arith.constant 0 : i32
    %50 = arith.cmpi ne, %49, %c0_i32_24 : i32
    scf.if %50 {
      %c0_25 = arith.constant 0 : index
      %c0_26 = arith.constant 0 : index
      %51 = vector.load %arg7[%c0_25, %c0_26] : memref<8x1xf32, #tpu.memory_space<vmem>>, vector<8x1xf32>
      %cst_27 = arith.constant 1.000000e-30 : f32
      %52 = vector.broadcast %cst_27 : f32 to vector<8x1xf32>
      %53 = arith.maximumf %51, %52 : vector<8x1xf32>
      %54 = tpu.reciprocal %53 {approx = true} : vector<8x1xf32> -> vector<8x1xf32>
      %c0_28 = arith.constant 0 : index
      %c0_29 = arith.constant 0 : index
      %55 = vector.load %arg8[%c0_28, %c0_29] : memref<8x128xf32, #tpu.memory_space<vmem>>, vector<8x128xf32>
      %56 = vector.broadcast %54 : vector<8x1xf32> to vector<8x128xf32>
      %57 = arith.mulf %55, %56 : vector<8x128xf32>
      %c0_30 = arith.constant 0 : index
      %c0_31 = arith.constant 0 : index
      %58 = vector.load %arg5[%c0_30, %c0_31] : memref<8x128xf32, #tpu.memory_space<vmem>>, vector<8x128xf32>
      tpu.vector_store %arg5[%c0_30, %c0_31], %57 {strides = array<i32>} : memref<8x128xf32, #tpu.memory_space<vmem>>, vector<8x128xf32>,
    } else {
    }
    return
  }
  func.func @transform_0(%arg0: i32, %arg1: i32) -> (i32, i32) {
    %c0_i32 = arith.constant 0 : i32
    %c0_i32_0 = arith.constant 0 : i32
    return %arg1, %c0_i32 : i32, i32
  }
  func.func @transform_1(%arg0: i32, %arg1: i32) -> (i32, i32) {
    %c0_i32 = arith.constant 0 : i32
    %c0_i32_0 = arith.constant 0 : i32
    return %c0_i32, %arg1 : i32, i32
  }
  func.func @transform_2(%arg0: i32, %arg1: i32) -> (i32, i32) {
    %c0_i32 = arith.constant 0 : i32
    %c0_i32_0 = arith.constant 0 : i32
    %c0_i32_1 = arith.constant 0 : i32
    return %c0_i32, %c0_i32_0 : i32, i32
  }
  func.func @transform_3(%arg0: i32, %arg1: i32) -> (i32, i32) {
    %c0_i32 = arith.constant 0 : i32
    %c0_i32_0 = arith.constant 0 : i32
    return %arg0, %c0_i32 : i32, i32
  }
}

</mosaic_0001>

<bundles_post_ra>
// kernel: tpu_custom_call.1
= control target key start
LH: loop header
LB: loop body
LE: loop exit
PB: predicated region body
PF: predicated region fallthrough
CT: control target
= control target key end

     0   :  { %8 = vsyncpa [#allocation6], 0  ;;  %s1276_s0 = inlined_call_operand.hbm [shape: f32[512,128], index: 0, kind: input, shape index: {}]   ;;  %s1277_s1 = inlined_call_operand.hbm [shape: s32[1,512], index: 1, kind: input, shape index: {}]   ;;  %s1278_s2 = inlined_call_operand.vmem [shape: f32[1,128], index: 2, kind: input, shape index: {}]   ;;  %s1279_s3 = inlined_call_operand.hbm [shape: f32[8,128], index: 3, kind: output, shape index: {}]  }
   0x1   :  { %10 = vsyncpa [#allocation6 + $0x1], 0 }
   0x2   :  { %11 = vsyncpa [#allocation9], 0 }
   0x3   :  { %13 = vsyncpa [#allocation9 + $0x1], 0 }
   0x4   :  { %14 = vsyncpa [#allocation7], 0  ;;  %s1033_s12 = smov 0   ;;  %s1035_s13 = smov 0  }
   0x5   :  { %s1037_s14 = smov 0   ;;  %s1039_s15 = smov 0  }
   0x6   :  { %s1041_s16 = smov 0   ;;  %s1043_s17 = smov 0  }
   0x7 LB: > { %s617_s18 = sadd.s32 4294967295, %s1001_s17   ;;  %s29_s19 = sadd.s32 1, %s997_s16  ;;  %s1001_s17 = sphi %s1043_s17, %s20_s17   ;;  %s997_s16 = sphi %s1041_s16, %s1294_s16   ;;  %s993_s15 = sphi %s1039_s15, %s1293_s15   ;;  %s989_s14 = sphi %s1037_s14, %s1292_s14   ;;  %s985_s13 = sphi %s1035_s13, %s1291_s13   ;;  %s981_s12 = sphi %s1033_s12, %s1290_s12  }
   0x8   : > { %p30_p0 = scmp.ge.s32.totalorder %s29_s19, 2  ;;  %s39_s20 = sadd.s32 1, %s989_s14 }
   0x9   : > { %p46_p1 = scmp.ne.s32.totalorder %s989_s14, %s985_s13  ;;  %p47_p2 = scmp.eq.s32.totalorder %s1001_s17, 0 }
   0xa   : > { %s1296_s19 = smov (%p30_p0, %s29_s19), 0  ;;  %p52_p4 = scmp.ne.s32.totalorder %s985_s13, %s981_s12 }
   0xb   : > { %p1069_p3 = por %p47_p2, %p46_p1  ;;  %s36_s22 = ssub.s32 %s997_s16, %s1296_s19 }
   0xc   : > { %p53_p5 = scmp.eq.s32.totalorder %s617_s18, 0  ;;  %p37_p6 = scmp.eq.s32.totalorder %s36_s22, 0 }
   0xd   : > { %p787_p8 = scmp.lt.s32.totalorder %s1001_s17, 2  ;;  %s1087_s25 = sand.u32 1, %s989_s14  }
   0xe   : > { %p1078_p7 = por %p53_p5, %p52_p4  ;;  %s637_s26 = sshll.u32 %s997_s16, 12 }
   0xf   : > { %s1084_s24 = scalar_select %p37_p6, %s989_s14, %s39_s20  }
  0x10   : > { %s1282_s23 = scalar_select %p1078_p7, 1, 0 }
  0x11   : > { %s620_s27 = sshll.u32 %s1087_s25, 8  ;;  %s1094_s30 = scalar_lea.hbm %s1276_s0, %s637_s26 }
  0x12   : > { %s156_s4 = scalar_lea.vmem [#allocation5], %s620_s27  ;;  %p1098_p9 = pnand %p787_p8, %p1069_p3 }
  0x13   : > { %s163_s5 = sshll.u32 %s156_s4, 4  ;;  %s153_s7 = scalar_lea.sflag [#allocation6], %s1087_s25  ;;  %s1102_s5 = int_to_ptr.vmem [resolvable:$true] %s163_s5 }
  0x14   : > { %s857_s8 = scalar_lea.hbm %s1094_s30, 4096  ;;  %p859_p11 = pneg %p1098_p9 }
  0x15   : > { %p858_p10 = scmp.ne.s32.totalorder %s1094_s30, %s857_s8  ;;  %s862_s11 = scalar_lea.hbm %s1276_s0, 8192 }
  0x16   : > { %p863_p0 = scmp.lt.u32.totalorder %s1094_s30, %s1276_s0  ;;  %p864_p1 = scmp.lt.u32.totalorder %s862_s11, %s857_s8 }
  0x17   : > { %p860_p12 = pnand %p859_p11, %p858_p10  ;;  %p866_p3 = scmp.lt.u32.totalorder %s857_s8, %s1094_s30 }
  0x18   : > { %p865_p2 = por %p864_p1, %p863_p0 }
  0x19   : > { %p861_p13 = pneg %p860_p12 }
  0x1a   : > { %p867_p4 = por %p866_p3, %p865_p2 }
  0x1c   : > { %p868_p5 = pnand %p867_p4, %p861_p13 }
  0x1e   : > { %871 = shalt.err (!%p868_p5)
}
  0x1f   : > { %s872_s21 = scalar_lea.vmem %s1102_s5, 4096  ;;  %s1003_s22 = smov [#allocation5]  }
  0x20   : > { %p873_p6 = scmp.ne.s32.totalorder %s1102_s5, %s872_s21  ;;  %s877_s26 = sshll.u32 %s1003_s22, 4  ;;  %s878_s26 = int_to_ptr.vmem [resolvable:$false] %s877_s26 }
  0x21   : > { %s879_s27 = scalar_lea.vmem %s878_s26, 8192  ;;  %p880_p12 = scmp.lt.s32.totalorder %s1102_s5, %s878_s26 }
  0x22   : > { %p875_p8 = pnand %p873_p6, %p859_p11  ;;  %p881_p0 = scmp.lt.s32.totalorder %s879_s27, %s872_s21 }
  0x24   : > { %p876_p10 = pneg %p875_p8  ;;  %p882_p1 = por %p881_p0, %p880_p12 }
  0x26   : > { %p883_p2 = pnand %p882_p1, %p876_p10 }
  0x28   : > { %886 = shalt.err (!%p883_p2)
}
  0x29   : > { %s1004_s28 = smov 128   ;;  %s1005_s29 = smov 8  }
  0x2a   : > { %783 = dma.hbm_to_vmem [thread:$0]  (!%p1098_p9), %s1094_s30, 4096, %s1102_s5, %s153_s7, %s1004_s28, %s1004_s28, %s1005_s29  }
  0x2b   : > { %p626_p13 = scmp.ge.s32.totalorder %s1001_s17, 1  ;;  %p190_p3 = scmp.lt.s32.totalorder %s1001_s17, 3 }
  0x2c   : > { %s623_s4 = sshll.u32 %s1087_s25, 1  ;;  %s638_s9 = sshll.u32 %s997_s16, 5 }
  0x2d   : > { %p1135_p4 = pnand %p626_p13, %p190_p3  ;;  %s177_s10 = scalar_lea.vmem [#allocation8], %s623_s4 }
  0x2e   : > { %s185_s11 = sshll.u32 %s177_s10, 4  ;;  %s1143_s21 = scalar_lea.hbm %s1277_s1, %s638_s9  ;;  %s186_s11 = int_to_ptr.vmem [resolvable:$true] %s185_s11 }
  0x2f   : > { %s1284_s8 = scalar_select %p1135_p4, 1, 0 }
  0x30   : > { %s174_s30 = scalar_lea.sflag [#allocation9], %s1087_s25  ;;  %s887_s5 = scalar_lea.hbm %s1143_s21, 32 }
  0x31   : > { %p888_p5 = scmp.ne.s32.totalorder %s1143_s21, %s887_s5  ;;  %s892_s26 = scalar_lea.hbm %s1277_s1, 64 }
  0x32   : > { %p893_p10 = scmp.lt.u32.totalorder %s1143_s21, %s1277_s1  ;;  %p894_p12 = scmp.lt.u32.totalorder %s892_s26, %s887_s5 }
  0x33   : > { %p890_p6 = pnand %p888_p5, %p859_p11  ;;  %p896_p1 = scmp.lt.u32.totalorder %s887_s5, %s1143_s21 }
  0x34   : > { %p895_p0 = por %p894_p12, %p893_p10 }
  0x35   : > { %p891_p8 = pneg %p890_p6 }
  0x36   : > { %p897_p2 = por %p896_p1, %p895_p0 }
  0x38   : > { %p898_p13 = pnand %p897_p2, %p891_p8 }
  0x3a   : > { %901 = shalt.err (!%p898_p13)
}
  0x3b   : > { %s902_s25 = scalar_lea.vmem %s186_s11, 32  ;;  %s1006_s29 = smov [#allocation8]  }
  0x3c   : > { %p903_p3 = scmp.ne.s32.totalorder %s186_s11, %s902_s25  ;;  %s907_s4 = sshll.u32 %s1006_s29, 4  ;;  %s908_s4 = int_to_ptr.vmem [resolvable:$false] %s907_s4 }
  0x3d   : > { %s909_s9 = scalar_lea.vmem %s908_s4, 64  ;;  %p910_p7 = scmp.lt.s32.totalorder %s186_s11, %s908_s4 }
  0x3e   : > { %p905_p5 = pnand %p903_p3, %p859_p11  ;;  %p911_p4 = scmp.lt.s32.totalorder %s909_s9, %s902_s25 }
  0x40   : > { %p906_p6 = pneg %p905_p5  ;;  %p912_p10 = por %p911_p4, %p910_p7 }
  0x42   : > { %p913_p12 = pnand %p912_p10, %p906_p6 }
  0x44   : > { %916 = shalt.err (!%p913_p12)
}
  0x45   : > { %786 = dma.hbm_to_vmem [thread:$0]  (!%p1098_p9), %s1143_s21, 32, %s186_s11, %s174_s30  }
  0x46   : > { %p1285_p8 = scmp.ne.s32.totalorder %s1284_s8, 0 }
  0x47   : > { %s196_s10 = sand.u32 (!%p1285_p8), 1, %s985_s13   ;;  %p1286_p11 = scmp.ne.s32.totalorder (!%p1285_p8), %s1282_s23, 0 }
  0x48   : > { %194 = sbr.rel (%p1285_p8) target bundleno = 1008 (0x3f0), region = 32  ;;  %s627_s12 = sshll.u32 (!%p1285_p8), %s196_s10, 8 }
  0x49   : > { %s197_s20 = scalar_lea.sflag (!%p1285_p8), [#allocation6], %s196_s10  ;;  %s1168_s5 = scalar_lea.vmem (!%p1285_p8), [#allocation5], %s627_s12 }
  0x4f   : > { %968 = dma.done.wait (%p1286_p11), %s197_s20, 4096  }
  0x50   : > { %970 = vsyncadd (%p1286_p11), %s197_s20, 4294963200  ;;  %s628_s7 = sshll.u32 %s196_s10, 1  ;;  %s206_s6 = scalar_lea.sflag [#allocation9], %s196_s10 }
  0x51   : > { %s1174_s22 = scalar_lea.vmem [#allocation8], %s628_s7 }
  0x52   : > { %972 = dma.done.wait (%p1286_p11), %s206_s6, 32  }
  0x53   : > { %974 = vsyncadd (%p1286_p11), %s206_s6, 4294967264  ;;  %p629_p7 = scmp.ne.s32.totalorder %s993_s15, 0 }
  0x54   : > { %vm239_vm0 = vcmask (!%p629_p7), 7168   ;;  %v1007_v0 = vmov (!%p629_p7), -1e+30   ;;  %v1008_v1 = vmov (!%p629_p7), 0.0  }
  0x55   : > { %238 = sbr.rel (%p629_p7) target bundleno = 92 (0x5c), region = 44  ;;  %240 = vst.msk [vmem:[#allocation2] sm:$0xff] (!%p629_p7), %vm239_vm0, %v1007_v0  ;;  %241 = vst.msk [vmem:[#allocation3] sm:$0xff] (!%p629_p7), %vm239_vm0, %v1008_v1 }
  0x56   : > { %242 = vst [vmem:[#allocation4] sm:$0xff] (!%p629_p7), %v1008_v1 }
  0x5c PF: > { %v259_v2 = vld [vmem:[%s1168_s5 + $0x80] sm:$0xff]  ;;  %v260_v3 = vld [vmem:[%s1168_s5 + $0x88] sm:$0xff]  ;;  %v261_v7 = vld [vmem:[%s1168_s5 + $0x90] sm:$0xff]  ;;  %v348_v51 = vlaneseq  ;;  %vm427_vm3 = vcmask 7168   ;;  %p632_p9 = scmp.ne.s32.totalorder %s993_s15, 1 }
  0x5d   : > { %v243_v4 = vld [vmem:[%s1168_s5] sm:$0xff]  ;;  %v708_v5 = vpack.c.bf16 %v260_v3, %v259_v2  ;;  %v244_v6 = vld [vmem:[%s1168_s5 + $0x8] sm:$0xff]  ;;  %v262_v8 = vld [vmem:[%s1168_s5 + $0x98] sm:$0xff]  ;;  %v1009_v2 = vmov 0  }
  0x5e   : > { %v710_v9 = vpack.c.bf16 %v244_v6, %v243_v4  ;;  %v712_v10 = vpack.c.bf16 %v262_v8, %v261_v7  ;;  %v245_v11 = vld [vmem:[%s1168_s5 + $0x10] sm:$0xff]  ;;  %v246_v12 = vld [vmem:[%s1168_s5 + $0x18] sm:$0xff]  ;;  %v263_v13 = vld [vmem:[%s1168_s5 + $0xa0] sm:$0xff]  ;;  %v349_v52 = vshrl.u32 %v348_v51, 7  ;;  %846 = vset.pattern.permute.xlu0 %v1009_v2  ;;  %847 = vset.pattern.permute.xlu1 %v1009_v2  ;;  %v1010_v7 = vmov 0.0  }
  0x5f   : > { %709 = vmatprep.subr.bf16.mxu0 %v708_v5  ;;  %741 = vmatprep.subr.bf16.mxu1 %v708_v5  ;;  %v264_v14 = vld [vmem:[%s1168_s5 + $0xa8] sm:$0xff]  ;;  %v714_v15 = vpack.c.bf16 %v246_v12, %v245_v11  ;;  %v247_v17 = vld [vmem:[%s1168_s5 + $0x20] sm:$0xff]  ;;  %v265_v19 = vld [vmem:[%s1168_s5 + $0xb0] sm:$0xff] }
  0x60   : > { %711 = vmatpush3.bf16.xpose.msra.mxu0 %v710_v9  ;;  %743 = vmatpush3.bf16.msra.mxu1 %v710_v9  ;;  %v716_v16 = vpack.c.bf16 %v264_v14, %v263_v13  ;;  %v248_v18 = vld [vmem:[%s1168_s5 + $0x28] sm:$0xff]  ;;  %v266_v20 = vld [vmem:[%s1168_s5 + $0xb8] sm:$0xff]  ;;  %v249_v24 = vld [vmem:[%s1168_s5 + $0x30] sm:$0xff]  ;;  %v354_v53 = vsub.s32 0, %v349_v52  ;;  %v358_v55 = vsub.s32 1, %v349_v52 }
  0x61   : > { %713 = vmatprep.subr.bf16.mxu0 %v712_v10  ;;  %745 = vmatprep.subr.bf16.mxu1 %v712_v10  ;;  %v718_v21 = vpack.c.bf16 %v248_v18, %v247_v17  ;;  %v276_v22 = vld [vmem:[%s1278_s2] sm:$0x1]  ;;  %v720_v23 = vpack.c.bf16 %v266_v20, %v265_v19  ;;  %v250_v25 = vld [vmem:[%s1168_s5 + $0x38] sm:$0xff]  ;;  %v267_v26 = vld [vmem:[%s1168_s5 + $0xc0] sm:$0xff] }
  0x62   : > { %671 = vmatprep.mubr.f32.mxu0 %v276_v22  ;;  %v268_v27 = vld [vmem:[%s1168_s5 + $0xc8] sm:$0xff]  ;;  %v722_v28 = vpack.c.bf16 %v250_v25, %v249_v24  ;;  %v251_v30 = vld [vmem:[%s1168_s5 + $0x40] sm:$0xff]  ;;  %v269_v32 = vld [vmem:[%s1168_s5 + $0xd0] sm:$0xff] }
  0x63   : > { %v724_v29 = vpack.c.bf16 %v268_v27, %v267_v26  ;;  %v252_v31 = vld [vmem:[%s1168_s5 + $0x48] sm:$0xff]  ;;  %v270_v33 = vld [vmem:[%s1168_s5 + $0xd8] sm:$0xff]  ;;  %v253_v36 = vld [vmem:[%s1168_s5 + $0x50] sm:$0xff] }
  0x64   : > { %747 = vmatpush3.bf16.msra.mxu1 %v714_v15  ;;  %v726_v34 = vpack.c.bf16 %v252_v31, %v251_v30  ;;  %v728_v35 = vpack.c.bf16 %v270_v33, %v269_v32  ;;  %v254_v37 = vld [vmem:[%s1168_s5 + $0x58] sm:$0xff]  ;;  %v271_v38 = vld [vmem:[%s1168_s5 + $0xe0] sm:$0xff]  ;;  %v272_v39 = vld [vmem:[%s1168_s5 + $0xe8] sm:$0xff] }
  0x65   : > { %749 = vmatprep.subr.bf16.mxu1 %v716_v16  ;;  %v730_v40 = vpack.c.bf16 %v254_v37, %v253_v36  ;;  %v732_v41 = vpack.c.bf16 %v272_v39, %v271_v38  ;;  %v255_v42 = vld [vmem:[%s1168_s5 + $0x60] sm:$0xff]  ;;  %v256_v43 = vld [vmem:[%s1168_s5 + $0x68] sm:$0xff]  ;;  %v273_v44 = vld [vmem:[%s1168_s5 + $0xf0] sm:$0xff] }
  0x66   : > { %v274_v45 = vld [vmem:[%s1168_s5 + $0xf8] sm:$0xff]  ;;  %v734_v46 = vpack.c.bf16 %v256_v43, %v255_v42  ;;  %v257_v48 = vld [vmem:[%s1168_s5 + $0x70] sm:$0xff]  ;;  %v275_v54 = vld [vmem:[%s1174_s22] sm:$0x3] }
  0x67   : > { %v736_v47 = vpack.c.bf16 %v274_v45, %v273_v44  ;;  %v258_v49 = vld [vmem:[%s1168_s5 + $0x78] sm:$0xff]  ;;  %v355_v56 = vrot.slane %v275_v54, %v354_v53  ;;  %v359_v57 = vrot.slane %v275_v54, %v358_v55  ;;  %v366_v3 = vld [vmem:[#allocation2] sm:$0xff] }
  0x68   : > { %715 = vmatpush3.bf16.xpose.msra.mxu0 %v714_v15  ;;  %751 = vmatpush3.bf16.msra.mxu1 %v718_v21  ;;  %v738_v50 = vpack.c.bf16 %v258_v49, %v257_v48  ;;  %v429_v44 = vld [vmem:[#allocation4] sm:$0xff] }
  0x69   : > { %717 = vmatprep.subr.bf16.mxu0 %v716_v16  ;;  %753 = vmatprep.subr.bf16.mxu1 %v720_v23  ;;  %vm1217_vm1 = vcmp.eq.s32.totalorder %v349_v52, %v355_v56  ;;  %vm361_vm2 = vcmp.eq.s32.totalorder %v349_v52, %v359_v57  ;;  %v1011_v52 = vmov (!%p632_p9), 0  }
  0x6a   : > { %v630_v8 = vsel %vm1217_vm1, 1.0, %v1010_v7  ;;  %v631_v9 = vsel %vm361_vm2, 1.0, %v1010_v7 }
  0x6c   : > { %755 = vmatpush3.bf16.msra.mxu1 %v722_v28 }
  0x6d   : > { %757 = vmatprep.subr.bf16.mxu1 %v724_v29 }
  0x70   : > { %719 = vmatpush3.bf16.xpose.msra.mxu0 %v718_v21  ;;  %759 = vmatpush3.bf16.msra.mxu1 %v726_v34 }
  0x71   : > { %721 = vmatprep.subr.bf16.mxu0 %v720_v23  ;;  %761 = vmatprep.subr.bf16.mxu1 %v728_v35 }
  0x74   : > { %763 = vmatpush3.bf16.msra.mxu1 %v730_v40 }
  0x75   : > { %765 = vmatprep.subr.bf16.mxu1 %v732_v41 }
  0x78   : > { %723 = vmatpush3.bf16.xpose.msra.mxu0 %v722_v28  ;;  %767 = vmatpush3.bf16.msra.mxu1 %v734_v46 }
  0x79   : > { %725 = vmatprep.subr.bf16.mxu0 %v724_v29  ;;  %769 = vmatprep.subr.bf16.mxu1 %v736_v47 }
  0x7c   : > { %771 = vmatpush3.bf16.msra.mxu1 %v738_v50 }
  0x80   : > { %727 = vmatpush3.bf16.xpose.msra.mxu0 %v726_v34 }
  0x81   : > { %729 = vmatprep.subr.bf16.mxu0 %v728_v35 }
  0x88   : > { %731 = vmatpush3.bf16.xpose.msra.mxu0 %v730_v40  ;;  %v421_v40 = vld [vmem:[#allocation3] sm:$0xff] }
  0x89   : > { %733 = vmatprep.subr.bf16.mxu0 %v732_v41 }
  0x90   : > { %735 = vmatpush3.bf16.xpose.msra.mxu0 %v734_v46 }
  0x91   : > { %737 = vmatprep.subr.bf16.mxu0 %v736_v47 }
  0x98   : > { %739 = vmatpush3.bf16.xpose.msra.mxu0 %v738_v50 }
  0x9f   : > { %672 = vmatmul.mubr.f32.vlgmr.msra.gmra.mrb[0].mxu0 %v276_v22 }
 0x172   : > { %v343_v58 = vpop.f32.mrb[0].mxu0 }
 0x173   : > { %v370_v60 = vrot.slane %v343_v58, %v354_v53  ;;  %v345_v61 = vpop.f32.mrb[1].mxu0 }
 0x174   : > { %v374_v62 = vrot.slane %v345_v61, %v354_v53 }
 0x175   : > { %v375_v63 = vsel %vm1217_vm1, %v370_v60, -1e+30 }
 0x176   : > { %v376_v0 = vsel %vm361_vm2, %v374_v62, -1e+30 }
 0x177   : > { %v377_v1 = vmax.f32 %v375_v63, %v376_v0 }
 0x179   : > { %378 = vmax.xlane.f32.xlu0 %v377_v1 }
 0x206   : > { %v379_v4 = vpop.xlane.xlu0 %378 }
 0x207   : > { %v380_v5 = vmax.f32 %v366_v3, %v379_v4 }
 0x209   : > { %v381_v6 = vsub.f32 %v366_v3, %v380_v5  ;;  %508 = vst.msk [vmem:[#allocation2] sm:$0xff] %vm427_vm3, %v380_v5  ;;  %386 = vperm.xlu0 %846, %v380_v5  }
 0x20b   : > { %v382_v38 = vmul.f32 1.442695, %v381_v6 }
 0x20d   : > { %854 = vset.pattern.permute.xlu0 (!%p632_p9), %v1011_v52 }
 0x288   : > { %v387_v10 = vpop.permute.xlu0 %386 }
 0x289   : > { %v389_v11 = vmul.f32 %v630_v8, %v387_v10  ;;  %v390_v12 = vmul.f32 %v631_v9, %v387_v10 }
 0x28b   : > { %v391_v13 = vrot.slane %v389_v11, 4  ;;  %v397_v14 = vrot.slane %v390_v12, 4 }
 0x28d   : > { %v392_v15 = vadd.f32 %v391_v13, %v389_v11  ;;  %v398_v16 = vadd.f32 %v397_v14, %v390_v12 }
 0x28f   : > { %v393_v17 = vrot.slane %v392_v15, 2  ;;  %v399_v18 = vrot.slane %v398_v16, 2 }
 0x291   : > { %v394_v19 = vadd.f32 %v393_v17, %v392_v15  ;;  %v400_v20 = vadd.f32 %v399_v18, %v398_v16 }
 0x293   : > { %v395_v21 = vrot.slane %v394_v19, 1  ;;  %v401_v22 = vrot.slane %v400_v20, 1 }
 0x295   : > { %v396_v23 = vadd.f32 %v395_v21, %v394_v19  ;;  %v402_v24 = vadd.f32 %v401_v22, %v400_v20 }
 0x297   : > { %v403_v25 = vsub.f32 %v343_v58, %v396_v23  ;;  %v404_v26 = vsub.f32 %v345_v61, %v402_v24 }
 0x299   : > { %v405_v27 = vmin.f32 %v403_v25, 0.0  ;;  %v406_v28 = vmin.f32 %v404_v26, 0.0 }
 0x29b   : > { %v407_v29 = vmul.f32 1.442695, %v405_v27  ;;  %v409_v30 = vmul.f32 1.442695, %v406_v28 }
 0x29d   : > { %848 = vpow2.f32 %v407_v29 }
 0x29e   : > { %850 = vpow2.f32 %v409_v30 }
 0x29f   : > { %852 = vpow2.f32 %v382_v38 }
 0x2a7   : > { %v849_v31 = vpop.eup %848 }
 0x2a8   : > { %v851_v32 = vpop.eup %850  ;;  %v414_v33 = vrot.slane %v849_v31, %v354_v53 }
 0x2a9   : > { %v418_v34 = vrot.slane %v851_v32, %v354_v53  ;;  %v853_v39 = vpop.eup %852 }
 0x2aa   : > { %v419_v35 = vmul.f32 %v630_v8, %v414_v33  ;;  %v422_v41 = vmul.f32 %v853_v39, %v421_v40 }
 0x2ab   : > { %v420_v36 = vmul.f32 %v631_v9, %v418_v34 }
 0x2ad   : > { %500 = vmatprep.mubr.f32.mxu1 %v420_v36  ;;  %v423_v37 = vadd.f32 %v420_v36, %v419_v35 }
 0x2ae   : > { %501 = vmatmul.mubr.f32.vlgmr.msra.gmra.mrb[0].mxu1 %v419_v35 }
 0x2af   : > { %424 = vadd.xlane.f32.xlu1 %v423_v37 }
 0x2c0   : > { %432 = vperm.xlu1 %847, %v853_v39  }
 0x33c   : > { %v425_v42 = vpop.xlane.xlu1 %424 }
 0x33d   : > { %v426_v43 = vadd.f32 %v425_v42, %v422_v41 }
 0x33f   : > { %428 = vst.msk [vmem:[#allocation3] sm:$0xff] %vm427_vm3, %v426_v43 }
 0x340   : > { %v433_v45 = vpop.permute.xlu1 %432 }
 0x341   : > { %v435_v48 = vmul.f32 %v433_v45, %v429_v44 }
 0x346   : > { %v513_v51 = vld [vmem:[#allocation3] sm:$0xff] (!%p632_p9) }
 0x347   : > { %v514_v53 = vmax.f32 (!%p632_p9), %v513_v51, 1e-30 }
 0x349   : > { %855 = vrcp.f32 (!%p632_p9), %v514_v53 }
 0x353   : > { %v856_v54 = vpop.eup (!%p632_p9), %855 }
 0x354   : > { %519 = vperm.xlu0 (!%p632_p9), %854, %v856_v54  }
 0x381   : > { %v705_v46 = vpop.f32.mrb[0].mxu1  ;;  %512 = sbr.rel (%p632_p9) target bundleno = 983 (0x3d7), region = 48 }
 0x382   : > { %v706_v47 = vpop.f32.mrb[1].mxu1 }
 0x383   : > { %v707_v49 = vadd.f32 %v706_v47, %v705_v46 }
 0x385   : > { %v506_v50 = vadd.f32 %v707_v49, %v435_v48 }
 0x387   : > { %507 = vst [vmem:[#allocation4] sm:$0xff] %v506_v50 }
 0x38e   : > { %v516_v55 = vld [vmem:[#allocation4] sm:$0xff] }
 0x3d3   : > { %v520_v56 = vpop.permute.xlu0 %519 }
 0x3d4   : > { %v522_v57 = vmul.f32 %v520_v56, %v516_v55 }
 0x3d6   : > { %523 = vst [vmem:[#allocation10] sm:$0xff] %v522_v57 }
 0x3d7 PF: > { %p1232_p4 = scmp.eq.s32.totalorder %s617_s18, 1  ;;  %s1012_s15 = smov [#allocation10]  }
 0x3d8   : > { %s533_s21 = sshll.u32 %s1012_s15, 4  ;;  %s534_s21 = int_to_ptr.vmem [resolvable:$true] %s533_s21 }
 0x3d9   : > { %s917_s30 = scalar_lea.vmem %s534_s21, 128  ;;  %p924_p13 = scmp.lt.s32.totalorder %s534_s21, %s534_s21 }
 0x3da   : > { %p918_p0 = scmp.ne.s32.totalorder %s534_s21, %s917_s30  ;;  %p925_p3 = scmp.lt.s32.totalorder %s917_s30, %s917_s30 }
 0x3dc   : > { %p919_p1 = pnand %p918_p0, %p1232_p4  ;;  %p926_p5 = por %p925_p3, %p924_p13 }
 0x3de   : > { %p920_p2 = pneg %p919_p1 }
 0x3e0   : > { %p927_p6 = pnand %p926_p5, %p920_p2 }
 0x3e2   : > { %930 = shalt.err (!%p927_p6)
}
 0x3e3   : > { %s931_s18 = scalar_lea.hbm %s1279_s3, 128 }
 0x3e4   : > { %p932_p10 = scmp.ne.s32.totalorder %s1279_s3, %s931_s18  ;;  %p937_p11 = scmp.lt.u32.totalorder %s931_s18, %s1279_s3 }
 0x3e6   : > { %p933_p12 = pnand %p932_p10, %p1232_p4 }
 0x3e8   : > { %p934_p8 = pneg %p933_p12 }
 0x3ea   : > { %p939_p7 = pnand %p937_p11, %p934_p8 }
 0x3ec   : > { %942 = shalt.err (!%p939_p7)
}
 0x3ed   : > { %777 = dma.vmem_to_hbm [thread:$0]  (%p1232_p4), %s534_s21, 128, %s1279_s3, [#allocation7]  }
 0x3ee   : > { %976 = dma.done.wait (%p1232_p4), [#allocation7], 128  }
 0x3ef   : > { %978 = vsyncadd (%p1232_p4), [#allocation7], 4294967168 }
 0x3f0 PF: > { %s20_s17 = sadd.s32 1, %s1001_s17   ;;  %s1290_s12 = smov %s985_s13 }
 0x3f1   : > { %p17_p9 = scmp.ge.s32.totalorder %s20_s17, 4   ;;  %s1291_s13 = smov %s989_s14 }
 0x3f2   : > { %s1292_s14 = smov %s1084_s24  ;;  %s1293_s15 = smov %s997_s16 }
 0x3f3   : > { %s1294_s16 = smov %s1296_s19  ;;  %19 = sbr.rel (!%p17_p9) target bundleno = 7 (0x7), region = 91 }
 0x3fa   :  { %546 = vsyncpa [#allocation6], 1 }
 0x3fb   :  { %548 = vsyncpa [#allocation6 + $0x1], 1 }
 0x3fc   :  { %549 = vsyncpa [#allocation9], 1 }
 0x3fd   :  { %551 = vsyncpa [#allocation9 + $0x1], 1 }
 0x3fe   :  { %552 = vsyncpa [#allocation7], 1 }
 0x3ff   :  { %554 = vsyncpa [#allocation7 + $0x1], 1 }

</bundles_post_ra>
